<compile_context>
chip_gen: v7x
topology: tpu7x:2x2x1
jax: 0.10.0
libtpu: 0.0.40
codegen_flags: <defaults>
</compile_context>

<pallas_src>
import functools
import math

import jax
import jax.numpy as jnp
import numpy as np
from jax.experimental import pallas as pl
from jax.experimental.pallas import tpu as pltpu


def _mha_kernel(bias_ref, qcat_ref, kcat_ref, v_ref,
                wq_ref, bq_ref, wk_ref, bk_ref,
                wv_ref, bv_ref, wo_ref, bo_ref,
                o_ref, *, nb_head, d_k):
    R, T, KD = qcat_ref.shape          # rows (nodes) per tile, time, K*d_model
    D = nb_head * d_k
    RT = R * T
    f32 = jnp.float32
    bf16 = jnp.bfloat16

    # --- temporal "context aware" conv == single KD-deep matmul (taps fused) ---
    q2 = jnp.dot(qcat_ref[...].reshape(RT, KD), wq_ref[...],
                 preferred_element_type=f32) + bq_ref[...]       # scale folded in
    k2 = jnp.dot(kcat_ref[...].reshape(RT, KD), wk_ref[...],
                 preferred_element_type=f32) + bk_ref[...]
    # --- value linear projection ---
    v2 = jnp.dot(v_ref[...].reshape(RT, D), wv_ref[...],
                 preferred_element_type=f32) + bv_ref[...]

    q3 = q2.reshape(R, T, D)
    k3 = k2.reshape(R, T, D)
    v3 = v2.reshape(R, T, D)

    # --- batch all heads into one (nb_head*R, T, d_k) einsum pair ---
    def heads(x3):                      # (R, T, D) -> (h*R, T, d_k) bf16
        return jnp.concatenate(
            [x3[:, :, h * d_k:(h + 1) * d_k] for h in range(nb_head)],
            axis=0).astype(bf16)

    qh = heads(q3)
    kh = heads(k3)
    vh = heads(v3)

    s = jnp.einsum('gqd,gkd->gqk', qh, kh, preferred_element_type=f32)
    s = s + bias_ref[...][None, :, :]           # additive mask bias, one broadcast

    # softmax in f32; divide moved to the EUP slot
    m = jnp.max(s, axis=-1, keepdims=True)
    p = jnp.exp(s - m)
    p = p * pl.reciprocal(jnp.sum(p, axis=-1, keepdims=True), approx=True)
    # TODO(synk): training-mode attention dropout not emitted (eval / p=0.0).

    oh = jnp.einsum('gqk,gkd->gqd', p.astype(bf16), vh,
                    preferred_element_type=f32)                 # (h*R, T, d_k)

    # merge heads back into channel order [head0 | head1 | ...]
    attn = jnp.concatenate(
        [oh[h * R:(h + 1) * R] for h in range(nb_head)], axis=-1)   # (R, T, D)

    # --- output linear ---
    out = jnp.dot(attn.reshape(RT, D).astype(bf16), wo_ref[...],
                  preferred_element_type=f32) + bo_ref[...]
    o_ref[...] = out.reshape(R, T, D).astype(o_ref.dtype)


def _pick_row_tile(B, N, T, target_sublanes):
    """Nodes per grid step; N is padded up to a multiple of the result."""
    R = max(1, min(N, target_sublanes // max(T, 1)))
    # If the batch axis alone cannot feed v7x's two TensorCores, keep >=2 grid
    # steps along N (neutral on single-TC v5e/v6e).
    if B < 2 and N > 1:
        R = min(R, pl.cdiv(N, 2))
    return R


def mha_temporal_context_q1d_k1d(query, key, value, mask, params, *,
                                 nb_head, kernel_size=3, target_sublanes=4096):
    """
    query/key/value : (B, N, T, d_model) float32
    mask            : (B, T, T) or None (positions where mask == 0 are masked out)
    params          : PyTorch-layout weights:
        wq_conv/wk_conv : (d_model, d_model, 1, K)   Conv2d weights
        bq_conv/bk_conv : (d_model,)
        wv, wo          : (d_model, d_model)         Linear weights (out, in)
        bv, bo          : (d_model,)
    """
    B, N, T, D = query.shape
    assert D % nb_head == 0
    assert kernel_size % 2 == 1, "same-length conv output requires odd kernel_size"
    K = kernel_size
    pad = (K - 1) // 2
    d_k = D // nb_head
    scale = 1.0 / math.sqrt(d_k)
    KD = K * D
    bf16 = jnp.bfloat16
    f32 = jnp.float32

    # --- one-time weight re-layout (PyTorch layout -> matmul layout), bf16 ---
    # Conv2d weight (O, I, 1, K) -> stacked (K*I, O); 1/sqrt(d_k) folded into q.
    wq = (jnp.transpose(params["wq_conv"][:, :, 0, :], (2, 1, 0)).reshape(KD, D)
          * scale).astype(bf16)
    wk = jnp.transpose(params["wk_conv"][:, :, 0, :], (2, 1, 0)).reshape(KD, D).astype(bf16)
    bq = (params["bq_conv"] * scale).reshape(1, D).astype(f32)
    bk = params["bk_conv"].reshape(1, D).astype(f32)
    # Linear weight (O, I) -> (I, O) so the kernel computes x @ W.T.
    wv = params["wv"].T.astype(bf16)
    wo = params["wo"].T.astype(bf16)
    bv = params["bv"].reshape(1, D).astype(f32)
    bo = params["bo"].reshape(1, D).astype(f32)

    # --- im2col along time (wrapper side): conv becomes one KD-deep matmul ---
    qp = jnp.pad(query, ((0, 0), (0, 0), (pad, pad), (0, 0)))
    kp = jnp.pad(key, ((0, 0), (0, 0), (pad, pad), (0, 0)))
    qcat = jnp.concatenate([qp[:, :, j:j + T, :] for j in range(K)], axis=-1)
    kcat = jnp.concatenate([kp[:, :, j:j + T, :] for j in range(K)], axis=-1)

    # --- additive mask bias (computed once; kernel just adds it) ---
    if mask is None:
        bias = jnp.zeros((B, T, T), f32)
    else:
        bias = jnp.where(mask == 0, jnp.float32(-1e9), jnp.float32(0.0)).astype(f32)

    # --- row-tile sizing; pad N so R never degenerates (R need not divide N) ---
    R = _pick_row_tile(B, N, T, target_sublanes)
    Np = pl.cdiv(N, R) * R
    if Np != N:
        padn = ((0, 0), (0, Np - N), (0, 0), (0, 0))
        qcat = jnp.pad(qcat, padn)
        kcat = jnp.pad(kcat, padn)
        value = jnp.pad(value, padn)

    qcat = qcat.astype(bf16)
    kcat = kcat.astype(bf16)
    v_in = value.astype(bf16)

    grid = (B, Np // R)
    kernel = functools.partial(_mha_kernel, nb_head=nb_head, d_k=d_k)

    # Generous but v7x-safe scoped-VMEM limit (64 MiB physical per TC there).
    vmem_limit = 44 * 1024 * 1024

    out = pl.pallas_call(
        kernel,
        out_shape=jax.ShapeDtypeStruct((B, Np, T, D), f32),
        grid_spec=pltpu.PrefetchScalarGridSpec(
            num_scalar_prefetch=0,
            grid=grid,
            in_specs=[
                pl.BlockSpec((None, T, T), lambda b, n: (b, 0, 0)),         # mask bias
                pl.BlockSpec((None, R, T, KD), lambda b, n: (b, n, 0, 0)),  # q im2col
                pl.BlockSpec((None, R, T, KD), lambda b, n: (b, n, 0, 0)),  # k im2col
                pl.BlockSpec((None, R, T, D), lambda b, n: (b, n, 0, 0)),   # value
                pl.BlockSpec((KD, D), lambda b, n: (0, 0)),                 # wq (resident)
                pl.BlockSpec((1, D), lambda b, n: (0, 0)),                  # bq
                pl.BlockSpec((KD, D), lambda b, n: (0, 0)),                 # wk (resident)
                pl.BlockSpec((1, D), lambda b, n: (0, 0)),                  # bk
                pl.BlockSpec((D, D), lambda b, n: (0, 0)),                  # wv (resident)
                pl.BlockSpec((1, D), lambda b, n: (0, 0)),                  # bv
                pl.BlockSpec((D, D), lambda b, n: (0, 0)),                  # wo (resident)
                pl.BlockSpec((1, D), lambda b, n: (0, 0)),                  # bo
            ],
            out_specs=pl.BlockSpec((None, R, T, D), lambda b, n: (b, n, 0, 0)),
        ),
        compiler_params=pltpu.CompilerParams(
            dimension_semantics=("parallel", "parallel"),
            vmem_limit_bytes=vmem_limit),
    )(bias, qcat, kcat, v_in, wq, bq, wk, bk, wv, bv, wo, bo)

    return out[:, :N] if Np != N else out


def _reference(query, key, value, mask, params, *, nb_head, kernel_size):
    """Pure-JAX replica of the PyTorch forward (default single-segment branch)."""
    B, N, T, D = query.shape
    K = kernel_size
    pad = (K - 1) // 2
    d_k = D // nb_head
    hp = jax.lax.Precision.HIGHEST

    def tconv(x, w, b):
        xp = jnp.pad(x, ((0, 0), (0, 0), (pad, pad), (0, 0)))
        out = jnp.zeros((B, N, T, D), jnp.float32) + b
        for j in range(K):
            out = out + jnp.einsum('bntd,od->bnto', xp[:, :, j:j + T, :],
                                   w[:, :, 0, j], precision=hp)
        return out

    q = tconv(query, params['wq_conv'], params['bq_conv'])
    k = tconv(key, params['wk_conv'], params['bk_conv'])
    v = jnp.einsum('bntd,od->bnto', value, params['wv'], precision=hp) + params['bv']

    def split(x):
        return x.reshape(B, N, T, nb_head, d_k).transpose(0, 1, 3, 2, 4)

    qh, kh, vh = split(q), split(k), split(v)
    s = jnp.einsum('bnhqd,bnhkd->bnhqk', qh, kh, precision=hp) / math.sqrt(d_k)
    if mask is not None:
        s = jnp.where(mask[:, None, None, :, :] == 0, -1e9, s)
    p_attn = jax.nn.softmax(s, axis=-1)
    o = jnp.einsum('bnhqk,bnhkd->bnhqd', p_attn, vh, precision=hp)
    o = o.transpose(0, 1, 3, 2, 4).reshape(B, N, T, D)
    return jnp.einsum('bntd,od->bnto', o, params['wo'], precision=hp) + params['bo']


if __name__ == "__main__":
    # Small shapes consistent with the module: (batch, N nodes, T time, d_model).
    # N=5 with a deliberately tiny row tile exercises the node-padding /
    # multi-step-grid path (production default target_sublanes=4096).
    B, N, T, D = 2, 5, 8, 32
    NB_HEAD, KSIZE = 4, 3

    key0 = jax.random.PRNGKey(0)
    keys = jax.random.split(key0, 12)

    def w(k, shape, fan_in):
        return jax.random.normal(k, shape, jnp.float32) / math.sqrt(fan_in)

    params = {
        "wq_conv": w(keys[0], (D, D, 1, KSIZE), D * KSIZE),
        "bq_conv": w(keys[1], (D,), D * KSIZE),
        "wk_conv": w(keys[2], (D, D, 1, KSIZE), D * KSIZE),
        "bk_conv": w(keys[3], (D,), D * KSIZE),
        "wv":      w(keys[4], (D, D), D),
        "bv":      w(keys[5], (D,), D),
        "wo":      w(keys[6], (D, D), D),
        "bo":      w(keys[7], (D,), D),
    }

    query = jax.random.normal(keys[8], (B, N, T, D), jnp.float32)
    key_a = jax.random.normal(keys[9], (B, N, T, D), jnp.float32)
    value = jax.random.normal(keys[10], (B, N, T, D), jnp.float32)
    # Causal mask shared across the batch (module signature: mask is (batch, T, T)).
    mask = jnp.tile(jnp.tril(jnp.ones((T, T), jnp.float32))[None], (B, 1, 1))

    out = mha_temporal_context_q1d_k1d(query, key_a, value, mask, params,
                                       nb_head=NB_HEAD, kernel_size=KSIZE,
                                       target_sublanes=16)
    out = jax.block_until_ready(out)

    ref = _reference(query, key_a, value, mask, params,
                     nb_head=NB_HEAD, kernel_size=KSIZE)
    # bf16 MXU operands (f32 accumulation) -> relaxed tolerance vs f32 reference.
    np.testing.assert_allclose(np.asarray(out), np.asarray(ref),
                               rtol=5e-2, atol=5e-2)
    print("KERNEL_OK")
</pallas_src>

<mosaic_0001>
module attributes {stable_mosaic.version = 11 : i64} {
  func.func @_mha_kernel(%arg0: i32, %arg1: i32, %arg2: memref<1x8x8xf32, #tpu.memory_space<vmem>>, %arg3: memref<1x2x8x96xbf16, #tpu.memory_space<vmem>>, %arg4: memref<1x2x8x96xbf16, #tpu.memory_space<vmem>>, %arg5: memref<1x2x8x32xbf16, #tpu.memory_space<vmem>>, %arg6: memref<96x32xbf16, #tpu.memory_space<vmem>>, %arg7: memref<1x32xf32, #tpu.memory_space<vmem>>, %arg8: memref<96x32xbf16, #tpu.memory_space<vmem>>, %arg9: memref<1x32xf32, #tpu.memory_space<vmem>>, %arg10: memref<32x32xbf16, #tpu.memory_space<vmem>>, %arg11: memref<1x32xf32, #tpu.memory_space<vmem>>, %arg12: memref<32x32xbf16, #tpu.memory_space<vmem>>, %arg13: memref<1x32xf32, #tpu.memory_space<vmem>>, %arg14: memref<1x2x8x32xf32, #tpu.memory_space<vmem>>) attributes {dimension_semantics = [#tpu.dimension_semantics<parallel>, #tpu.dimension_semantics<parallel>], iteration_bounds = array<i64: 2, 3>, scalar_prefetch = 0 : i64, scratch_operands = 0 : i64, tpu.core_type = #tpu.core_type<tc>, window_params = [{transform_indices = @transform_0, window_bounds = array<i64: 1, 8, 8>}, {transform_indices = @transform_1, window_bounds = array<i64: 1, 2, 8, 96>}, {transform_indices = @transform_2, window_bounds = array<i64: 1, 2, 8, 96>}, {transform_indices = @transform_3, window_bounds = array<i64: 1, 2, 8, 32>}, {pipeline_mode = #tpu.pipeline_mode<synchronous>, transform_indices = @transform_4, window_bounds = array<i64: 96, 32>}, {pipeline_mode = #tpu.pipeline_mode<synchronous>, transform_indices = @transform_5, window_bounds = array<i64: 1, 32>}, {pipeline_mode = #tpu.pipeline_mode<synchronous>, transform_indices = @transform_6, window_bounds = array<i64: 96, 32>}, {pipeline_mode = #tpu.pipeline_mode<synchronous>, transform_indices = @transform_7, window_bounds = array<i64: 1, 32>}, {pipeline_mode = #tpu.pipeline_mode<synchronous>, transform_indices = @transform_8, window_bounds = array<i64: 32, 32>}, {pipeline_mode = #tpu.pipeline_mode<synchronous>, transform_indices = @transform_9, window_bounds = array<i64: 1, 32>}, {pipeline_mode = #tpu.pipeline_mode<synchronous>, transform_indices = @transform_10, window_bounds = array<i64: 32, 32>}, {pipeline_mode = #tpu.pipeline_mode<synchronous>, transform_indices = @transform_11, window_bounds = array<i64: 1, 32>}, {transform_indices = @transform_12, window_bounds = array<i64: 1, 2, 8, 32>}]} {
    %c0 = arith.constant 0 : index
    %c0_0 = arith.constant 0 : index
    %c0_1 = arith.constant 0 : index
    %c0_2 = arith.constant 0 : index
    %0 = vector.load %arg3[%c0, %c0_0, %c0_1, %c0_2] : memref<1x2x8x96xbf16, #tpu.memory_space<vmem>>, vector<1x2x8x96xbf16>
    %1 = vector.shape_cast %0 : vector<1x2x8x96xbf16> to vector<2x8x96xbf16>
    %2 = vector.shape_cast %1 : vector<2x8x96xbf16> to vector<16x96xbf16>
    %c0_3 = arith.constant 0 : index
    %c0_4 = arith.constant 0 : index
    %3 = vector.load %arg6[%c0_3, %c0_4] : memref<96x32xbf16, #tpu.memory_space<vmem>>, vector<96x32xbf16>
    %cst = arith.constant dense<0.000000e+00> : vector<16x32xf32>
    %4 = tpu.matmul %2, %3, %cst {dimension_numbers = #tpu.dot_dimension_numbers<[1], [0], [0], [1], [0, 0, 1, 1], [], []>} : vector<16x96xbf16>, vector<96x32xbf16>, vector<16x32xf32> -> vector<16x32xf32>
    %c0_5 = arith.constant 0 : index
    %c0_6 = arith.constant 0 : index
    %5 = vector.load %arg7[%c0_5, %c0_6] : memref<1x32xf32, #tpu.memory_space<vmem>>, vector<1x32xf32>
    %6 = vector.broadcast %5 : vector<1x32xf32> to vector<16x32xf32>
    %7 = arith.addf %4, %6 : vector<16x32xf32>
    %c0_7 = arith.constant 0 : index
    %c0_8 = arith.constant 0 : index
    %c0_9 = arith.constant 0 : index
    %c0_10 = arith.constant 0 : index
    %8 = vector.load %arg4[%c0_7, %c0_8, %c0_9, %c0_10] : memref<1x2x8x96xbf16, #tpu.memory_space<vmem>>, vector<1x2x8x96xbf16>
    %9 = vector.shape_cast %8 : vector<1x2x8x96xbf16> to vector<2x8x96xbf16>
    %10 = vector.shape_cast %9 : vector<2x8x96xbf16> to vector<16x96xbf16>
    %c0_11 = arith.constant 0 : index
    %c0_12 = arith.constant 0 : index
    %11 = vector.load %arg8[%c0_11, %c0_12] : memref<96x32xbf16, #tpu.memory_space<vmem>>, vector<96x32xbf16>
    %cst_13 = arith.constant dense<0.000000e+00> : vector<16x32xf32>
    %12 = tpu.matmul %10, %11, %cst_13 {dimension_numbers = #tpu.dot_dimension_numbers<[1], [0], [0], [1], [0, 0, 1, 1], [], []>} : vector<16x96xbf16>, vector<96x32xbf16>, vector<16x32xf32> -> vector<16x32xf32>
    %c0_14 = arith.constant 0 : index
    %c0_15 = arith.constant 0 : index
    %13 = vector.load %arg9[%c0_14, %c0_15] : memref<1x32xf32, #tpu.memory_space<vmem>>, vector<1x32xf32>
    %14 = vector.broadcast %13 : vector<1x32xf32> to vector<16x32xf32>
    %15 = arith.addf %12, %14 : vector<16x32xf32>
    %c0_16 = arith.constant 0 : index
    %c0_17 = arith.constant 0 : index
    %c0_18 = arith.constant 0 : index
    %c0_19 = arith.constant 0 : index
    %16 = vector.load %arg5[%c0_16, %c0_17, %c0_18, %c0_19] : memref<1x2x8x32xbf16, #tpu.memory_space<vmem>>, vector<1x2x8x32xbf16>
    %17 = vector.shape_cast %16 : vector<1x2x8x32xbf16> to vector<2x8x32xbf16>
    %18 = vector.shape_cast %17 : vector<2x8x32xbf16> to vector<16x32xbf16>
    %c0_20 = arith.constant 0 : index
    %c0_21 = arith.constant 0 : index
    %19 = vector.load %arg10[%c0_20, %c0_21] : memref<32x32xbf16, #tpu.memory_space<vmem>>, vector<32x32xbf16>
    %cst_22 = arith.constant dense<0.000000e+00> : vector<16x32xf32>
    %20 = tpu.matmul %18, %19, %cst_22 {dimension_numbers = #tpu.dot_dimension_numbers<[1], [0], [0], [1], [0, 0, 1, 1], [], []>} : vector<16x32xbf16>, vector<32x32xbf16>, vector<16x32xf32> -> vector<16x32xf32>
    %c0_23 = arith.constant 0 : index
    %c0_24 = arith.constant 0 : index
    %21 = vector.load %arg11[%c0_23, %c0_24] : memref<1x32xf32, #tpu.memory_space<vmem>>, vector<1x32xf32>
    %22 = vector.broadcast %21 : vector<1x32xf32> to vector<16x32xf32>
    %23 = arith.addf %20, %22 : vector<16x32xf32>
    %24 = vector.shape_cast %7 : vector<16x32xf32> to vector<2x8x32xf32>
    %25 = vector.shape_cast %15 : vector<16x32xf32> to vector<2x8x32xf32>
    %26 = vector.shape_cast %23 : vector<16x32xf32> to vector<2x8x32xf32>
    %27 = vector.extract_strided_slice %24 {offsets = [0, 0, 0], sizes = [2, 8, 8], strides = [1, 1, 1]} : vector<2x8x32xf32> to vector<2x8x8xf32>
    %28 = vector.extract_strided_slice %24 {offsets = [0, 0, 8], sizes = [2, 8, 8], strides = [1, 1, 1]} : vector<2x8x32xf32> to vector<2x8x8xf32>
    %29 = vector.extract_strided_slice %24 {offsets = [0, 0, 16], sizes = [2, 8, 8], strides = [1, 1, 1]} : vector<2x8x32xf32> to vector<2x8x8xf32>
    %30 = vector.extract_strided_slice %24 {offsets = [0, 0, 24], sizes = [2, 8, 8], strides = [1, 1, 1]} : vector<2x8x32xf32> to vector<2x8x8xf32>
    %31 = tpu.concatenate %27, %28, %29, %30 in 0 : vector<2x8x8xf32>, vector<2x8x8xf32>, vector<2x8x8xf32>, vector<2x8x8xf32> -> vector<8x8x8xf32>
    %32 = arith.truncf %31 : vector<8x8x8xf32> to vector<8x8x8xbf16>
    %33 = vector.extract_strided_slice %25 {offsets = [0, 0, 0], sizes = [2, 8, 8], strides = [1, 1, 1]} : vector<2x8x32xf32> to vector<2x8x8xf32>
    %34 = vector.extract_strided_slice %25 {offsets = [0, 0, 8], sizes = [2, 8, 8], strides = [1, 1, 1]} : vector<2x8x32xf32> to vector<2x8x8xf32>
    %35 = vector.extract_strided_slice %25 {offsets = [0, 0, 16], sizes = [2, 8, 8], strides = [1, 1, 1]} : vector<2x8x32xf32> to vector<2x8x8xf32>
    %36 = vector.extract_strided_slice %25 {offsets = [0, 0, 24], sizes = [2, 8, 8], strides = [1, 1, 1]} : vector<2x8x32xf32> to vector<2x8x8xf32>
    %37 = tpu.concatenate %33, %34, %35, %36 in 0 : vector<2x8x8xf32>, vector<2x8x8xf32>, vector<2x8x8xf32>, vector<2x8x8xf32> -> vector<8x8x8xf32>
    %38 = arith.truncf %37 : vector<8x8x8xf32> to vector<8x8x8xbf16>
    %39 = vector.extract_strided_slice %26 {offsets = [0, 0, 0], sizes = [2, 8, 8], strides = [1, 1, 1]} : vector<2x8x32xf32> to vector<2x8x8xf32>
    %40 = vector.extract_strided_slice %26 {offsets = [0, 0, 8], sizes = [2, 8, 8], strides = [1, 1, 1]} : vector<2x8x32xf32> to vector<2x8x8xf32>
    %41 = vector.extract_strided_slice %26 {offsets = [0, 0, 16], sizes = [2, 8, 8], strides = [1, 1, 1]} : vector<2x8x32xf32> to vector<2x8x8xf32>
    %42 = vector.extract_strided_slice %26 {offsets = [0, 0, 24], sizes = [2, 8, 8], strides = [1, 1, 1]} : vector<2x8x32xf32> to vector<2x8x8xf32>
    %43 = tpu.concatenate %39, %40, %41, %42 in 0 : vector<2x8x8xf32>, vector<2x8x8xf32>, vector<2x8x8xf32>, vector<2x8x8xf32> -> vector<8x8x8xf32>
    %44 = arith.truncf %43 : vector<8x8x8xf32> to vector<8x8x8xbf16>
    "tpu.trace_start"() <{level = 10 : i32, message = "gqd,gkd->gqk"}> : () -> ()
    %cst_25 = arith.constant dense<0.000000e+00> : vector<8x8x8xf32>
    %45 = tpu.matmul %32, %38, %cst_25 {dimension_numbers = #tpu.dot_dimension_numbers<[2], [2], [1], [1], [0, 0, 0, 1, 1, 1], [0], [0]>} : vector<8x8x8xbf16>, vector<8x8x8xbf16>, vector<8x8x8xf32> -> vector<8x8x8xf32>
    "tpu.trace_stop"() : () -> ()
    %c0_26 = arith.constant 0 : index
    %c0_27 = arith.constant 0 : index
    %c0_28 = arith.constant 0 : index
    %46 = vector.load %arg2[%c0_26, %c0_27, %c0_28] : memref<1x8x8xf32, #tpu.memory_space<vmem>>, vector<1x8x8xf32>
    %47 = vector.shape_cast %46 : vector<1x8x8xf32> to vector<8x8xf32>
    %48 = vector.shape_cast %47 : vector<8x8xf32> to vector<1x8x8xf32>
    %49 = vector.broadcast %48 : vector<1x8x8xf32> to vector<8x8x8xf32>
    %50 = arith.addf %45, %49 : vector<8x8x8xf32>
    %cst_29 = arith.constant dense<0xFF800000> : vector<8x8xf32>
    %51 = vector.multi_reduction <maximumf>, %50, %cst_29 [2] : vector<8x8x8xf32> to vector<8x8xf32>
    %52 = vector.shape_cast %51 : vector<8x8xf32> to vector<8x8x1xf32>
    %53 = vector.broadcast %52 : vector<8x8x1xf32> to vector<8x8x8xf32>
    %54 = arith.subf %50, %53 : vector<8x8x8xf32>
    %55 = math.exp %54 : vector<8x8x8xf32>
    %cst_30 = arith.constant dense<0.000000e+00> : vector<8x8xf32>
    %56 = vector.multi_reduction <add>, %55, %cst_30 [2] : vector<8x8x8xf32> to vector<8x8xf32>
    %57 = vector.shape_cast %56 : vector<8x8xf32> to vector<8x8x1xf32>
    %58 = tpu.reciprocal %57 {approx = true} : vector<8x8x1xf32> -> vector<8x8x1xf32>
    %59 = vector.broadcast %58 : vector<8x8x1xf32> to vector<8x8x8xf32>
    %60 = arith.mulf %55, %59 : vector<8x8x8xf32>
    %61 = arith.truncf %60 : vector<8x8x8xf32> to vector<8x8x8xbf16>
    "tpu.trace_start"() <{level = 10 : i32, message = "gqk,gkd->gqd"}> : () -> ()
    %cst_31 = arith.constant dense<0.000000e+00> : vector<8x8x8xf32>
    %62 = tpu.matmul %61, %44, %cst_31 {dimension_numbers = #tpu.dot_dimension_numbers<[2], [1], [1], [2], [0, 0, 0, 1, 1, 2], [0], [0]>} : vector<8x8x8xbf16>, vector<8x8x8xbf16>, vector<8x8x8xf32> -> vector<8x8x8xf32>
    "tpu.trace_stop"() : () -> ()
    %63 = vector.extract_strided_slice %62 {offsets = [0, 0, 0], sizes = [2, 8, 8], strides = [1, 1, 1]} : vector<8x8x8xf32> to vector<2x8x8xf32>
    %64 = vector.extract_strided_slice %62 {offsets = [2, 0, 0], sizes = [2, 8, 8], strides = [1, 1, 1]} : vector<8x8x8xf32> to vector<2x8x8xf32>
    %65 = vector.extract_strided_slice %62 {offsets = [4, 0, 0], sizes = [2, 8, 8], strides = [1, 1, 1]} : vector<8x8x8xf32> to vector<2x8x8xf32>
    %66 = vector.extract_strided_slice %62 {offsets = [6, 0, 0], sizes = [2, 8, 8], strides = [1, 1, 1]} : vector<8x8x8xf32> to vector<2x8x8xf32>
    %67 = tpu.concatenate %63, %64, %65, %66 in 2 : vector<2x8x8xf32>, vector<2x8x8xf32>, vector<2x8x8xf32>, vector<2x8x8xf32> -> vector<2x8x32xf32>
    %68 = vector.shape_cast %67 : vector<2x8x32xf32> to vector<16x32xf32>
    %69 = arith.truncf %68 : vector<16x32xf32> to vector<16x32xbf16>
    %c0_32 = arith.constant 0 : index
    %c0_33 = arith.constant 0 : index
    %70 = vector.load %arg12[%c0_32, %c0_33] : memref<32x32xbf16, #tpu.memory_space<vmem>>, vector<32x32xbf16>
    %cst_34 = arith.constant dense<0.000000e+00> : vector<16x32xf32>
    %71 = tpu.matmul %69, %70, %cst_34 {dimension_numbers = #tpu.dot_dimension_numbers<[1], [0], [0], [1], [0, 0, 1, 1], [], []>} : vector<16x32xbf16>, vector<32x32xbf16>, vector<16x32xf32> -> vector<16x32xf32>
    %c0_35 = arith.constant 0 : index
    %c0_36 = arith.constant 0 : index
    %72 = vector.load %arg13[%c0_35, %c0_36] : memref<1x32xf32, #tpu.memory_space<vmem>>, vector<1x32xf32>
    %73 = vector.broadcast %72 : vector<1x32xf32> to vector<16x32xf32>
    %74 = arith.addf %71, %73 : vector<16x32xf32>
    %75 = vector.shape_cast %74 : vector<16x32xf32> to vector<2x8x32xf32>
    %c0_37 = arith.constant 0 : index
    %c0_38 = arith.constant 0 : index
    %c0_39 = arith.constant 0 : index
    %c0_40 = arith.constant 0 : index
    %76 = vector.load %arg14[%c0_37, %c0_38, %c0_39, %c0_40] : memref<1x2x8x32xf32, #tpu.memory_space<vmem>>, vector<1x2x8x32xf32>
    %77 = vector.shape_cast %76 : vector<1x2x8x32xf32> to vector<2x8x32xf32>
    %78 = vector.shape_cast %75 : vector<2x8x32xf32> to vector<1x2x8x32xf32>
    tpu.vector_store %arg14[%c0_37, %c0_38, %c0_39, %c0_40], %78 {strides = array<i32>} : memref<1x2x8x32xf32, #tpu.memory_space<vmem>>, vector<1x2x8x32xf32>,
    return
  }
  func.func @transform_0(%arg0: i32, %arg1: i32) -> (i32, i32, i32) {
    %c0_i32 = arith.constant 0 : i32
    %c0_i32_0 = arith.constant 0 : i32
    %c0_i32_1 = arith.constant 0 : i32
    return %arg0, %c0_i32, %c0_i32_0 : i32, i32, i32
  }
  func.func @transform_1(%arg0: i32, %arg1: i32) -> (i32, i32, i32, i32) {
    %c0_i32 = arith.constant 0 : i32
    %c0_i32_0 = arith.constant 0 : i32
    %c0_i32_1 = arith.constant 0 : i32
    return %arg0, %arg1, %c0_i32, %c0_i32_0 : i32, i32, i32, i32
  }
  func.func @transform_2(%arg0: i32, %arg1: i32) -> (i32, i32, i32, i32) {
    %c0_i32 = arith.constant 0 : i32
    %c0_i32_0 = arith.constant 0 : i32
    %c0_i32_1 = arith.constant 0 : i32
    return %arg0, %arg1, %c0_i32, %c0_i32_0 : i32, i32, i32, i32
  }
  func.func @transform_3(%arg0: i32, %arg1: i32) -> (i32, i32, i32, i32) {
    %c0_i32 = arith.constant 0 : i32
    %c0_i32_0 = arith.constant 0 : i32
    %c0_i32_1 = arith.constant 0 : i32
    return %arg0, %arg1, %c0_i32, %c0_i32_0 : i32, i32, i32, i32
  }
  func.func @transform_4(%arg0: i32, %arg1: i32) -> (i32, i32) {
    %c0_i32 = arith.constant 0 : i32
    %c0_i32_0 = arith.constant 0 : i32
    %c0_i32_1 = arith.constant 0 : i32
    return %c0_i32, %c0_i32_0 : i32, i32
  }
  func.func @transform_5(%arg0: i32, %arg1: i32) -> (i32, i32) {
    %c0_i32 = arith.constant 0 : i32
    %c0_i32_0 = arith.constant 0 : i32
    %c0_i32_1 = arith.constant 0 : i32
    return %c0_i32, %c0_i32_0 : i32, i32
  }
  func.func @transform_6(%arg0: i32, %arg1: i32) -> (i32, i32) {
    %c0_i32 = arith.constant 0 : i32
    %c0_i32_0 = arith.constant 0 : i32
    %c0_i32_1 = arith.constant 0 : i32
    return %c0_i32, %c0_i32_0 : i32, i32
  }
  func.func @transform_7(%arg0: i32, %arg1: i32) -> (i32, i32) {
    %c0_i32 = arith.constant 0 : i32
    %c0_i32_0 = arith.constant 0 : i32
    %c0_i32_1 = arith.constant 0 : i32
    return %c0_i32, %c0_i32_0 : i32, i32
  }
  func.func @transform_8(%arg0: i32, %arg1: i32) -> (i32, i32) {
    %c0_i32 = arith.constant 0 : i32
    %c0_i32_0 = arith.constant 0 : i32
    %c0_i32_1 = arith.constant 0 : i32
    return %c0_i32, %c0_i32_0 : i32, i32
  }
  func.func @transform_9(%arg0: i32, %arg1: i32) -> (i32, i32) {
    %c0_i32 = arith.constant 0 : i32
    %c0_i32_0 = arith.constant 0 : i32
    %c0_i32_1 = arith.constant 0 : i32
    return %c0_i32, %c0_i32_0 : i32, i32
  }
  func.func @transform_10(%arg0: i32, %arg1: i32) -> (i32, i32) {
    %c0_i32 = arith.constant 0 : i32
    %c0_i32_0 = arith.constant 0 : i32
    %c0_i32_1 = arith.constant 0 : i32
    return %c0_i32, %c0_i32_0 : i32, i32
  }
  func.func @transform_11(%arg0: i32, %arg1: i32) -> (i32, i32) {
    %c0_i32 = arith.constant 0 : i32
    %c0_i32_0 = arith.constant 0 : i32
    %c0_i32_1 = arith.constant 0 : i32
    return %c0_i32, %c0_i32_0 : i32, i32
  }
  func.func @transform_12(%arg0: i32, %arg1: i32) -> (i32, i32, i32, i32) {
    %c0_i32 = arith.constant 0 : i32
    %c0_i32_0 = arith.constant 0 : i32
    %c0_i32_1 = arith.constant 0 : i32
    return %arg0, %arg1, %c0_i32, %c0_i32_0 : i32, i32, i32, i32
  }
}

</mosaic_0001>

<bundles_post_ra>
// kernel: tpu_custom_call.1
= control target key start
LH: loop header
LB: loop body
LE: loop exit
PB: predicated region body
PF: predicated region fallthrough
CT: control target
= control target key end

     0   :  { %s3130_s0 = inlined_call_operand.vmem [shape: f32[2,8,8], index: 0, kind: input, shape index: {}]   ;;  %s3131_s1 = inlined_call_operand.vmem [shape: bf16[2,6,8,96], index: 1, kind: input, shape index: {}]   ;;  %s3132_s2 = inlined_call_operand.vmem [shape: bf16[2,6,8,96], index: 2, kind: input, shape index: {}]   ;;  %s3133_s3 = inlined_call_operand.hbm [shape: bf16[2,6,8,32], index: 3, kind: input, shape index: {}]   ;;  %s3134_s4 = inlined_call_operand.vmem [shape: bf16[96,32], index: 4, kind: input, shape index: {}]   ;;  %s3135_s5 = inlined_call_operand.vmem [shape: f32[1,32], index: 5, kind: input, shape index: {}]   ;;  %s3136_s6 = inlined_call_operand.vmem [shape: bf16[96,32], index: 6, kind: input, shape index: {}]   ;;  %s3137_s7 = inlined_call_operand.vmem [shape: f32[1,32], index: 7, kind: input, shape index: {}]   ;;  %s3138_s8 = inlined_call_operand.vmem [shape: bf16[32,32], index: 8, kind: input, shape index: {}]   ;;  %s3139_s9 = inlined_call_operand.vmem [shape: f32[1,32], index: 9, kind: input, shape index: {}]   ;;  %s3140_s10 = inlined_call_operand.vmem [shape: bf16[32,32], index: 10, kind: input, shape index: {}]   ;;  %s3141_s11 = inlined_call_operand.vmem [shape: f32[1,32], index: 11, kind: input, shape index: {}]   ;;  %s3142_s12 = inlined_call_operand.hbm [shape: f32[2,6,8,32], index: 12, kind: output, shape index: {}]  }
   0x1   :  { %3149 = sst [smem:[#allocation11_spill]] %s3130_s0 }
   0x2   :  { %3150 = sst [smem:[#allocation12_spill]] %s3135_s5 }
   0x3   :  { %3151 = sst [smem:[#allocation13_spill]] %s3139_s9 }
   0x4   :  { %3152 = sst [smem:[#allocation14_spill]] %s3140_s10 }
   0x5   :  { %3153 = sst [smem:[#allocation15_spill]] %s3141_s11 }
   0x6   :  { %3154 = sst [smem:[#allocation16_spill]] %s3142_s12 }
   0x7   :  { %17 = vsyncpa [#allocation3], 0 }
   0x8   :  { %19 = vsyncpa [#allocation3 + $0x1], 0 }
   0x9   :  { %20 = vsyncpa [#allocation4], 0 }
   0xa   :  { %22 = vsyncpa [#allocation4 + $0x1], 0  ;;  %s2675_s21 = smov 0   ;;  %s2677_s22 = smov 0  }
   0xb   :  { %s2679_s23 = smov 0   ;;  %s2681_s24 = smov 0  }
   0xc   :  { %s2683_s25 = smov 0   ;;  %s2685_s26 = smov 0  }
   0xd   :  { %s2687_s27 = smov 0   ;;  %s2689_s28 = smov 0  }
   0xe LB: > { %3155 = sst [smem:[#allocation8_spill]] %s2567_s21  ;;  %s2005_s29 = sadd.s32 4294967295, %s2595_s28   ;;  %s2595_s28 = sphi %s2689_s28, %s28_s28   ;;  %s2591_s27 = sphi %s2687_s27, %s3180_s27   ;;  %s2587_s26 = sphi %s2685_s26, %s3179_s26   ;;  %s2583_s25 = sphi %s2683_s25, %s3178_s25   ;;  %s2579_s24 = sphi %s2681_s24, %s3177_s24   ;;  %s2575_s23 = sphi %s2679_s23, %s3176_s23   ;;  %s2571_s22 = sphi %s2677_s22, %s3175_s22   ;;  %s2567_s21 = sphi %s2675_s21, %s3174_s21  }
   0xf   : > { %s2006_s30 = sadd.s32 4294967294, %s2595_s28   ;;  %s37_s13 = sadd.s32 1, %s2587_s26 }
  0x10   : > { %s40_s14 = sadd.s32 1, %s2591_s27  ;;  %p38_p0 = scmp.ge.s32.totalorder %s37_s13, 3 }
  0x11   : > { %s131_s15 = sadd.s32 1, %s2575_s23  ;;  %p138_p1 = scmp.ne.s32.totalorder %s2575_s23, %s2571_s22 }
  0x12   : > { %p139_p2 = scmp.eq.s32.totalorder %s2595_s28, 0  ;;  %s3182_s13 = smov (%p38_p0, %s37_s13), 0 }
  0x13   : > { %3156 = sst [smem:[#allocation9_spill]] %s3182_s13  ;;  %s3184_s14 = smov (!%p38_p0, %s40_s14), %s2591_s27 }
  0x14   : > { %s127_s16 = ssub.s32 %s2587_s26, %s3182_s13  ;;  %p2728_p3 = por %p139_p2, %p138_p1 }
  0x15   : > { %p42_p4 = scmp.ge.s32.totalorder %s3184_s14, 2  ;;  %p144_p5 = scmp.ne.s32.totalorder %s2571_s22, %s2567_s21 }
  0x16   : > { %p145_p6 = scmp.eq.s32.totalorder %s2005_s29, 0  ;;  %p338_p7 = scmp.eq.s32.totalorder %s2005_s29, 5 }
  0x17   : > { %s3186_s14 = smov (%p42_p4, %s3184_s14), 0  ;;  %p344_p10 = scmp.eq.s32.totalorder %s2006_s30, 5 }
  0x18   : > { %3158 = sst [smem:[#allocation10_spill]] %s3186_s14  ;;  %p2736_p8 = por %p145_p6, %p144_p5 }
  0x19   : > { %p2740_p9 = por %p338_p7, %p138_p1  ;;  %s126_s20 = ssub.s32 %s2591_s27, %s3186_s14 }
  0x1a   : > { %s128_s13 = sor.u32 %s127_s16, %s126_s20  ;;  %p2746_p12 = por %p344_p10, %p144_p5 }
  0x1b   : > { %s3160_s19 = scalar_select %p2740_p9, 1, 0 }
  0x1c   : > { %p129_p11 = scmp.eq.s32.totalorder %s128_s13, 0  ;;  %p2279_p13 = scmp.lt.s32.totalorder %s2595_s28, 6 }
  0x1d   : > { %s3161_s21 = scalar_select %p2746_p12, 1, 0 }
  0x1e   : > { %s421_s29 = sand.u32 1, %s2575_s23   ;;  %s2010_s10 = sshll.u32 %s2587_s26, 1 }
  0x1f   : > { %s2753_s12 = scalar_select %p129_p11, %s2575_s23, %s131_s15  }
  0x20   : > { %s2009_s11 = sshll.u32 %s421_s29, 3  ;;  %s2264_s0 = smul.u32 6, %s2591_s27 }
  0x21   : > { %s425_s9 = scalar_lea.vmem [#allocation2], %s2009_s11  ;;  %p2761_p0 = pnand %p2279_p13, %p2728_p3 }
  0x22   : > { %s434_s5 = sshll.u32 %s425_s9, 4  ;;  %s431_s13 = sadd.s32 %s2264_s0, %s2010_s10  ;;  %s2757_s5 = int_to_ptr.vmem [resolvable:$true] %s434_s5 }
  0x23   : > { %s2011_s16 = sshll.u32 %s431_s13, 6  ;;  %s2770_s9 = scalar_lea.sflag [#allocation3], %s421_s29 }
  0x24   : > { %s2768_s15 = scalar_lea.hbm %s3133_s3, %s2011_s16  ;;  %p2469_p2 = pneg %p2761_p0 }
  0x25   : > { %s2467_s11 = scalar_lea.hbm %s2768_s15, 128  ;;  %s2472_s14 = scalar_lea.hbm %s3133_s3, 768 }
  0x26   : > { %p2468_p1 = scmp.ne.s32.totalorder %s2768_s15, %s2467_s11  ;;  %p2473_p5 = scmp.lt.u32.totalorder %s2768_s15, %s3133_s3 }
  0x27   : > { %p2474_p6 = scmp.lt.u32.totalorder %s2472_s14, %s2467_s11  ;;  %p2476_p10 = scmp.lt.u32.totalorder %s2467_s11, %s2768_s15 }
  0x28   : > { %p2470_p3 = pnand %p2469_p2, %p2468_p1 }
  0x29   : > { %p2475_p7 = por %p2474_p6, %p2473_p5 }
  0x2a   : > { %p2471_p4 = pneg %p2470_p3 }
  0x2b   : > { %p2477_p11 = por %p2476_p10, %p2475_p7 }
  0x2d   : > { %p2478_p13 = pnand %p2477_p11, %p2471_p4 }
  0x2f   : > { %2481 = shalt.err (!%p2478_p13)
}
  0x30   : > { %s2482_s29 = scalar_lea.vmem %s2757_s5, 128  ;;  %s2597_s16 = smov [#allocation2]  }
  0x31   : > { %p2483_p1 = scmp.ne.s32.totalorder %s2757_s5, %s2482_s29  ;;  %s2487_s20 = sshll.u32 %s2597_s16, 4  ;;  %s2488_s20 = int_to_ptr.vmem [resolvable:$false] %s2487_s20 }
  0x32   : > { %s2489_s0 = scalar_lea.vmem %s2488_s20, 256  ;;  %p2490_p9 = scmp.lt.s32.totalorder %s2757_s5, %s2488_s20 }
  0x33   : > { %p2485_p3 = pnand %p2483_p1, %p2469_p2  ;;  %p2491_p5 = scmp.lt.s32.totalorder %s2489_s0, %s2482_s29 }
  0x35   : > { %p2486_p12 = pneg %p2485_p3  ;;  %p2492_p6 = por %p2491_p5, %p2490_p9 }
  0x37   : > { %p2493_p7 = pnand %p2492_p6, %p2486_p12 }
  0x39   : > { %2496 = shalt.err (!%p2493_p7)
}
  0x3a   : > { %s2598_s11 = smov 64   ;;  %s2599_s10 = smov 4  }
  0x3b   : > { %2274 = dma.hbm_to_vmem [thread:$0]  (!%p2761_p0), %s2768_s15, 128, %s2757_s5, %s2770_s9, %s2598_s11, %s2598_s11, %s2599_s10  }
  0x3c   : > { %p2012_p2 = scmp.ge.s32.totalorder %s2595_s28, 1  ;;  %p442_p4 = scmp.lt.s32.totalorder %s2595_s28, 7 }
  0x3e   : > { %p443_p10 = pnand %p2012_p2, %p442_p4 }
  0x3f   : > { %s2801_s14 = sand.u32 (!%p443_p10), 1, %s2571_s22  }
  0x40   : > { %446 = sbr.rel (%p443_p10) target bundleno = 1560 (0x618), region = 68  ;;  %s2013_s17 = sshll.u32 (!%p443_p10), %s2801_s14, 3 }
  0x41   : > { %s449_s13 = scalar_lea.sflag (!%p443_p10), [#allocation3], %s2801_s14  ;;  %s2805_s29 = scalar_lea.vmem (!%p443_p10), [#allocation2], %s2013_s17 }
  0x47   : > { %2558 = dma.done.wait (%p2736_p8), %s449_s13, 128  }
  0x48   : > { %2560 = vsyncadd (%p2736_p8), %s449_s13, 4294967168  ;;  %p515_p9 = scmp.lt.s32.totalorder %s2583_s25, 1  ;;  %s2813_s5 = sshll.u32 %s2579_s24, 1  ;;  %v2600_v0 = vmov 0.0   ;;  %vm2601_vm0 = vmmov 0   ;;  %v2416_v1 = vld [vmem:[%s3136_s6] sm:$0xff]  }
  0x49   : > { %2136 = vmatprep.subr.bf16.mxu1 %v2600_v0  ;;  %2120 = vmatprep.subr.bf16.mxu0 %v2600_v0  ;;  %p522_p12 = scmp.lt.s32.totalorder %s2813_s5, 5  ;;  %v2417_v2 = vld [vmem:[%s3134_s4] sm:$0xff]   ;;  %v2418_v3 = vld [vmem:[%s3136_s6 + $0x8] sm:$0xff]   ;;  %v2420_v5 = vld [vmem:[%s3136_s6 + $0x10] sm:$0xff]   ;;  %vm604_vm1 = vcmask 785408   ;;  %vm785_vm2 = vcmask 261120  }
  0x4a   : > { %2148 = vmatprep.mubr.msk.bf16.mxu1 %vm2601_vm0, %v2600_v0  ;;  %2132 = vmatprep.mubr.msk.bf16.mxu0 %vm2601_vm0, %v2600_v0  ;;  %s2823_s18 = scalar_select %p515_p9, %s2583_s25, 1  ;;  %v2419_v4 = vld [vmem:[%s3134_s4 + $0x8] sm:$0xff]   ;;  %v2421_v6 = vld [vmem:[%s3134_s4 + $0x10] sm:$0xff]   ;;  %v2422_v7 = vld [vmem:[%s3136_s6 + $0x18] sm:$0xff]   ;;  %vm915_vm3 = vcmask 64512   ;;  %vm1383_vm4 = vcmask 1043456  }
  0x4b   : > { %s523_s24 = scalar_select %p522_p12, %s2813_s5, 5  ;;  %2137 = vmatpush3.bf16.msra.mxu1 %v2416_v1  ;;  %2121 = vmatpush3.bf16.msra.mxu0 %v2417_v2  ;;  %v2423_v8 = vld [vmem:[%s3134_s4 + $0x18] sm:$0xff]   ;;  %v2424_v9 = vld [vmem:[%s3136_s6 + $0x20] sm:$0xff]   ;;  %v2426_v11 = vld [vmem:[%s3136_s6 + $0x28] sm:$0xff]   ;;  %vm1775_vm5 = vcmask 130048   ;;  %vm1778_vm6 = vcmask 195584  }
  0x4c   : > { %s2265_s9 = smul.u32 6, %s2823_s18  ;;  %2138 = vmatprep.subr.bf16.mxu1 %v2600_v0  ;;  %2122 = vmatprep.subr.bf16.mxu0 %v2600_v0  ;;  %v2425_v10 = vld [vmem:[%s3134_s4 + $0x20] sm:$0xff]   ;;  %v2428_v12 = vld [vmem:[%s3134_s4 + $0x28] sm:$0xff]   ;;  %s3163_s15 = sld [smem:[#allocation12_spill]] }
  0x4d   : > { %v2430_v15 = vld [vmem:[%s3138_s8] sm:$0xff]   ;;  %v2431_v16 = vld [vmem:[%s3138_s8 + $0x8] sm:$0xff]   ;;  %s2015_s10 = sshll.u32 %s2823_s18, 3  ;;  %s2606_s11 = smov 16  }
  0x4e   : > { %s525_s13 = sadd.s32 %s2265_s9, %s523_s24  ;;  %v2432_v17 = vld [vmem:[%s2805_s29] sm:$0xff]   ;;  %s2602_s29 = smov 112  }
  0x4f   : > { %2139 = vmatpush3.bf16.msra.mxu1 %v2418_v3  ;;  %2123 = vmatpush3.bf16.msra.mxu0 %v2419_v4  ;;  %s2017_s0 = sshll.u32 %s525_s13, 2  ;;  %v2029_v18 = vld [vmem:[%s3137_s7] ss:$0 sm:$0xff]  ;;  %s2604_s13 = smov 104  }
  0x50   : > { %2140 = vmatprep.subr.bf16.mxu1 %v2600_v0  ;;  %2124 = vmatprep.subr.bf16.mxu0 %v2600_v0  ;;  %s537_s17 = scalar_lea.vmem %s3132_s2, %s2017_s0  ;;  %s527_s20 = scalar_lea.vmem %s3131_s1, %s2017_s0 }
  0x51   : > { %v2427_v13 = vld [vmem:[%s537_s17] sm:$0xff]   ;;  %s2603_s0 = smov 120   ;;  %s3164_s17 = sld [smem:[#allocation13_spill]] }
  0x52   : > { %v2429_v14 = vld [vmem:[%s527_s20] sm:$0xff]   ;;  %s3165_s9 = sld [smem:[#allocation11_spill]]  ;;  %s2266_s20 = smul.u32 6, %s2583_s25 }
  0x53   : > { %2141 = vmatpush3.bf16.msra.mxu1 %v2420_v5  ;;  %2125 = vmatpush3.bf16.msra.mxu0 %v2421_v6  ;;  %v2020_v19 = vld [vmem:[%s3163_s15] ss:$0 sm:$0xff]  ;;  %s3167_s18 = sld [smem:[#allocation15_spill]]  ;;  %p3169_p0 = scmp.ne.s32.totalorder %s3160_s19, 0 }
  0x54   : > { %2142 = vmatprep.subr.bf16.mxu1 %v2600_v0  ;;  %2126 = vmatprep.subr.bf16.mxu0 %v2600_v0  ;;  %s1864_s24 = sadd.s32 %s2266_s20, %s2813_s5 }
  0x55   : > { %s2065_s16 = sshll.u32 %s1864_s24, 7  ;;  %s2608_s24 = smov [#allocation5]  }
  0x57   : > { %2143 = vmatpush3.bf16.msra.mxu1 %v2422_v7  ;;  %2127 = vmatpush3.bf16.msra.mxu0 %v2423_v8  ;;  %v2038_v6 = vld [vmem:[%s3164_s17] ss:$0 sm:$0xff]  ;;  %s2607_s17 = smov 24  }
  0x58   : > { %2144 = vmatprep.subr.bf16.mxu1 %v2600_v0  ;;  %2128 = vmatprep.subr.bf16.mxu0 %v2600_v0  ;;  %s518_s30 = scalar_lea.vmem %s3165_s9, %s2015_s10  ;;  %s2014_s10 = sshll.u32 %s2801_s14, 4 }
  0x59   : > { %s514_s15 = scalar_lea.vmem [#allocation5], %s2014_s10  ;;  %s1852_s10 = scalar_lea.sflag [#allocation4], %s2801_s14 }
  0x5a   : > { %s2501_s9 = sshll.u32 %s2608_s24, 4  ;;  %s2502_s9 = int_to_ptr.vmem [resolvable:$false] %s2501_s9 }
  0x5b   : > { %2145 = vmatpush3.bf16.msra.mxu1 %v2424_v9  ;;  %2129 = vmatpush3.bf16.msra.mxu0 %v2425_v10 }
  0x5c   : > { %2146 = vmatprep.subr.bf16.mxu1 %v2600_v0  ;;  %2130 = vmatprep.subr.bf16.mxu0 %v2600_v0 }
  0x5f   : > { %2147 = vmatpush3.bf16.msra.mxu1 %v2426_v11  ;;  %2131 = vmatpush3.bf16.msra.mxu0 %v2428_v12 }
  0x60   : > { %2160 = vmatprep.subr.bf16.mxu1 %v2600_v0  ;;  %2152 = vmatprep.subr.bf16.mxu0 %v2600_v0 }
  0x62   : > { %2149 = vmatmul.mubr.msk.bf16.vlgmr.msra.gmra.mrb[0].mxu1 %vm604_vm1, %v2427_v13  ;;  %2133 = vmatmul.mubr.msk.bf16.vlgmr.msra.gmra.mrb[0].mxu0 %vm604_vm1, %v2429_v14 }
  0x63   : > { %2162 = vmatprep.mubr.msk.bf16.mxu1 %vm2601_vm0, %v2600_v0  ;;  %2153 = vmatpush3.bf16.msra.mxu0 %v2430_v15 }
  0x64   : > { %2156 = vmatprep.mubr.msk.bf16.mxu0 %vm2601_vm0, %v2600_v0  ;;  %2154 = vmatprep.subr.bf16.mxu0 %v2600_v0 }
  0x67   : > { %2155 = vmatpush3.bf16.msra.mxu0 %v2431_v16 }
  0x68   : > { %2166 = vmatprep.subr.bf16.mxu0 %v2600_v0 }
  0x6a   : > { %2157 = vmatmul.mubr.msk.bf16.vlgmr.msra.gmra.mrb[4].mxu0 %vm785_vm2, %v2432_v17 }
  0x6b   : > { %2168 = vmatprep.mubr.msk.bf16.mxu0 %vm2601_vm0, %v2600_v0 }
 0x135   : > { %v748_v20 = vpop.f32.mrb[0].mxu1  ;;  %v642_v23 = vpop.f32.mrb[0].mxu0 }
 0x136   : > { %v749_v21 = vadd.f32 %v2029_v18, %v748_v20  ;;  %v2150_v22 = vpop.f32.mrb[1].mxu1  ;;  %v643_v25 = vadd.f32 %v2020_v19, %v642_v23  ;;  %v2134_v26 = vpop.f32.mrb[1].mxu0 }
 0x137   : > { %v751_v24 = vpop.f32.mrb[2].mxu1  ;;  %v645_v29 = vpop.f32.mrb[2].mxu0 }
 0x138   : > { %v752_v27 = vadd.f32 %v2029_v18, %v751_v24  ;;  %v2151_v28 = vpop.f32.mrb[3].mxu1  ;;  %v878_v30 = vpack.c.bf16 %v749_v21, %v749_v21  ;;  %v646_v31 = vadd.f32 %v2020_v19, %v645_v29  ;;  %v2135_v32 = vpop.f32.mrb[3].mxu0  ;;  %v850_v38 = vpack.c.bf16 %v643_v25, %v643_v25  ;;  %v914_v24 = vld [vmem:[%s518_s30] sm:$0xff]  ;;  %s2503_s30 = scalar_lea.vmem %s2502_s9, 512 }
 0x13a   : > { %v920_v33 = vsel %vm915_vm3, %v878_v30, 0  ;;  %v2366_v34 = vpack.i.bf16 %v752_v27, %v749_v21  ;;  %v879_v35 = vpack.c.bf16 %v752_v27, %v752_v27  ;;  %v2371_v36 = vpack.i.bf16 %v646_v31, %v643_v25 }
 0x13b   : > { %2161 = vmatpush3.bf16.xpose.msra.mxu1 %v920_v33  ;;  %v851_v39 = vpack.c.bf16 %v646_v31, %v646_v31 }
 0x13c   : > { %2367 = vrot.lane.b32.xlu1 %v2366_v34, %s2602_s29  ;;  %2357 = vrot.lane.b32.xlu0 %v2366_v34, %s2603_s0  ;;  %v966_v37 = vsel %vm915_vm3, %v879_v35, 0 }
 0x13d   : > { %2167 = vmatpush3.bf16.xpose.msra.mxu0 %v966_v37  ;;  %2172 = vmatprep.subr.bf16.mxu1 %v2600_v0  ;;  %v823_v40 = vpop.f32.mrb[4].mxu0 }
 0x13e   : > { %2178 = vmatprep.subr.bf16.mxu0 %v2600_v0  ;;  %v2158_v41 = vpop.f32.mrb[5].mxu0  ;;  %v2936_v10 = vadd.f32 %v2038_v6, %v823_v40 }
 0x13f   : > { %v826_v42 = vpop.f32.mrb[6].mxu0 }
 0x140   : > { %2372 = vrot.lane.b32.xlu1 %v2371_v36, %s2602_s29  ;;  %2362 = vrot.lane.b32.xlu0 %v2371_v36, %s2603_s0  ;;  %v2159_v43 = vpop.f32.mrb[7].mxu0  ;;  %v2938_v13 = vadd.f32 %v2038_v6, %v826_v42  ;;  %v906_v17 = vpack.c.bf16 %v2936_v10, %v2936_v10 }
 0x142   : > { %2163 = vmatmul.mubr.msk.bf16.vlgmr.msra.gmra.mrb[4].mxu1 %vm915_vm3, %v850_v38  ;;  %v907_v19 = vpack.c.bf16 %v2938_v13, %v2938_v13  ;;  %v1385_v21 = vsel %vm1383_vm4, %v906_v17, 0 }
 0x143   : > { %2174 = vmatprep.mubr.msk.bf16.mxu1 %vm2601_vm0, %v2600_v0 }
 0x144   : > { %2382 = vrot.lane.b32.xlu1 %v2371_v36, %s2604_s13  ;;  %2377 = vrot.lane.b32.xlu0 %v2366_v34, %s2604_s13  ;;  %v1431_v23 = vsel %vm1383_vm4, %v907_v19, 0 }
 0x145   : > { %2169 = vmatmul.mubr.msk.bf16.vlgmr.msra.gmra.mrb[8].mxu0 %vm915_vm3, %v851_v39 }
 0x146   : > { %2180 = vmatprep.mubr.msk.bf16.mxu0 %vm2601_vm0, %v2600_v0 }
 0x1ae   : > { %v2358_v44 = vpop.permute.xlu0 %2357  ;;  %v2368_v47 = vpop.permute.xlu1 %2367 }
 0x1af   : > { %v2360_v45 = vunpack.i.h.bf16 %v2358_v44  ;;  %v2359_v46 = vunpack.i.l.bf16 %v2358_v44  ;;  %v2369_v51 = vunpack.i.l.bf16 %v2368_v47  ;;  %v2370_v54 = vunpack.i.h.bf16 %v2368_v47 }
 0x1b1   : > { %v881_v48 = vpack.c.bf16 %v2360_v45, %v2360_v45  ;;  %v880_v49 = vpack.c.bf16 %v2359_v46, %v2359_v46  ;;  %v882_v57 = vpack.c.bf16 %v2369_v51, %v2369_v51  ;;  %v883_v58 = vpack.c.bf16 %v2370_v54, %v2370_v54 }
 0x1b2   : > { %v2363_v50 = vpop.permute.xlu0 %2362  ;;  %v2373_v1 = vpop.permute.xlu1 %2372 }
 0x1b3   : > { %v1012_v52 = vsel %vm915_vm3, %v880_v49, 0  ;;  %v1058_v53 = vsel %vm915_vm3, %v881_v48, 0  ;;  %v2364_v55 = vunpack.i.l.bf16 %v2363_v50  ;;  %v2365_v56 = vunpack.i.h.bf16 %v2363_v50 }
 0x1b4   : > { %2173 = vmatpush3.bf16.xpose.msra.mxu1 %v1012_v52  ;;  %2179 = vmatpush3.bf16.xpose.msra.mxu0 %v1058_v53  ;;  %v1104_v63 = vsel %vm915_vm3, %v882_v57, 0  ;;  %v1150_v3 = vsel %vm915_vm3, %v883_v58, 0  ;;  %v2374_v4 = vunpack.i.l.bf16 %v2373_v1  ;;  %v2375_v5 = vunpack.i.h.bf16 %v2373_v1 }
 0x1b5   : > { %2184 = vmatprep.subr.bf16.mxu1 %v2600_v0  ;;  %2190 = vmatprep.subr.bf16.mxu0 %v2600_v0  ;;  %v852_v60 = vpack.c.bf16 %v2364_v55, %v2364_v55  ;;  %v853_v61 = vpack.c.bf16 %v2365_v56, %v2365_v56 }
 0x1b6   : > { %v2378_v59 = vpop.permute.xlu0 %2377  ;;  %v854_v9 = vpack.c.bf16 %v2374_v4, %v2374_v4  ;;  %v855_v11 = vpack.c.bf16 %v2375_v5, %v2375_v5  ;;  %v2383_v12 = vpop.permute.xlu1 %2382 }
 0x1b7   : > { %v2379_v62 = vunpack.i.l.bf16 %v2378_v59  ;;  %v2380_v2 = vunpack.i.h.bf16 %v2378_v59  ;;  %v2384_v16 = vunpack.i.l.bf16 %v2383_v12  ;;  %v2385_v18 = vunpack.i.h.bf16 %v2383_v12 }
 0x1b9   : > { %v884_v7 = vpack.c.bf16 %v2379_v62, %v2379_v62  ;;  %v885_v8 = vpack.c.bf16 %v2380_v2, %v2380_v2  ;;  %v856_v20 = vpack.c.bf16 %v2384_v16, %v2384_v16  ;;  %v857_v22 = vpack.c.bf16 %v2385_v18, %v2385_v18 }
 0x1bb   : > { %2175 = vmatmul.mubr.msk.bf16.vlgmr.msra.gmra.mrb[8].mxu1 %vm915_vm3, %v852_v60  ;;  %2181 = vmatmul.mubr.msk.bf16.vlgmr.msra.gmra.mrb[12].mxu0 %vm915_vm3, %v853_v61  ;;  %v1196_v14 = vsel %vm915_vm3, %v884_v7, 0  ;;  %v1242_v15 = vsel %vm915_vm3, %v885_v8, 0 }
 0x1bc   : > { %2185 = vmatpush3.bf16.xpose.msra.mxu1 %v1104_v63  ;;  %2191 = vmatpush3.bf16.xpose.msra.mxu0 %v1150_v3 }
 0x1bd   : > { %2186 = vmatprep.mubr.msk.bf16.mxu1 %vm2601_vm0, %v2600_v0  ;;  %2192 = vmatprep.mubr.msk.bf16.mxu0 %vm2601_vm0, %v2600_v0 }
 0x1be   : > { %2196 = vmatprep.subr.bf16.mxu1 %v2600_v0  ;;  %2202 = vmatprep.subr.bf16.mxu0 %v2600_v0 }
 0x1c3   : > { %2187 = vmatmul.mubr.msk.bf16.vlgmr.msra.gmra.mrb[12].mxu1 %vm915_vm3, %v854_v9  ;;  %2193 = vmatmul.mubr.msk.bf16.vlgmr.msra.gmra.mrb[16].mxu0 %vm915_vm3, %v855_v11 }
 0x1c4   : > { %2197 = vmatpush3.bf16.xpose.msra.mxu1 %v1196_v14  ;;  %2203 = vmatpush3.bf16.xpose.msra.mxu0 %v1242_v15  ;;  %v2981_v15 = vpack.i.bf16 %v2938_v13, %v2936_v10 }
 0x1c5   : > { %2198 = vmatprep.mubr.msk.bf16.mxu1 %vm2601_vm0, %v2600_v0  ;;  %2204 = vmatprep.mubr.msk.bf16.mxu0 %vm2601_vm0, %v2600_v0 }
 0x1c6   : > { %2208 = vmatprep.subr.bf16.mxu1 %v2600_v0  ;;  %2214 = vmatprep.subr.bf16.mxu0 %v2600_v0 }
 0x1cb   : > { %2199 = vmatmul.mubr.msk.bf16.vlgmr.msra.gmra.mrb[16].mxu1 %vm915_vm3, %v856_v20  ;;  %2205 = vmatmul.mubr.msk.bf16.vlgmr.msra.gmra.mrb[20].mxu0 %vm915_vm3, %v857_v22 }
 0x1cc   : > { %2209 = vmatpush3.bf16.msra.mxu1 %v1385_v21  ;;  %2215 = vmatpush3.bf16.msra.mxu0 %v1431_v23 }
 0x1cd   : > { %2216 = vmatprep.mubr.msk.bf16.mxu0 %vm2601_vm0, %v2600_v0  ;;  %2226 = vmatprep.subr.bf16.mxu0 %v2600_v0 }
 0x1ce   : > { %2210 = vmatprep.mubr.msk.bf16.mxu1 %vm2601_vm0, %v2600_v0  ;;  %2220 = vmatprep.subr.bf16.mxu1 %v2600_v0 }
 0x215   : > { %v956_v25 = vpop.f32.mrb[4].mxu1 }
 0x216   : > { %v2968_v26 = vadd.f32 %v956_v25, %v914_v24  ;;  %v2164_v27 = vpop.f32.mrb[5].mxu1 }
 0x217   : > { %v959_v28 = vpop.f32.mrb[6].mxu1 }
 0x218   : > { %v1002_v29 = vpop.f32.mrb[8].mxu0  ;;  %v2165_v30 = vpop.f32.mrb[7].mxu1  ;;  %v1284_v31 = vsel %vm915_vm3, %v2968_v26, -inf }
 0x219   : > { %v1003_v32 = vadd.f32 %v1002_v29, %v914_v24  ;;  %v2170_v33 = vpop.f32.mrb[9].mxu0  ;;  %1285 = vmax.xlane.f32.xlu0 %v1284_v31 }
 0x21a   : > { %v1005_v34 = vpop.f32.mrb[10].mxu0 }
 0x21b   : > { %v2171_v35 = vpop.f32.mrb[11].mxu0  ;;  %v1287_v36 = vsel %vm915_vm3, %v1003_v32, -inf }
 0x21c   : > { %1288 = vmax.xlane.f32.xlu1 %v1287_v36 }
 0x28e   : > { %v1048_v37 = vpop.f32.mrb[8].mxu1  ;;  %v1094_v39 = vpop.f32.mrb[12].mxu0 }
 0x28f   : > { %v1049_v38 = vadd.f32 %v1048_v37, %v914_v24  ;;  %v2176_v40 = vpop.f32.mrb[9].mxu1  ;;  %v2182_v41 = vpop.f32.mrb[13].mxu0  ;;  %v1095_v43 = vadd.f32 %v1094_v39, %v914_v24 }
 0x290   : > { %v1051_v42 = vpop.f32.mrb[10].mxu1  ;;  %v1097_v44 = vpop.f32.mrb[14].mxu0 }
 0x291   : > { %v2177_v45 = vpop.f32.mrb[11].mxu1  ;;  %v1290_v46 = vsel %vm915_vm3, %v1049_v38, -inf  ;;  %v2183_v47 = vpop.f32.mrb[15].mxu0  ;;  %v1293_v48 = vsel %vm915_vm3, %v1095_v43, -inf }
 0x292   : > { %1291 = vmax.xlane.f32.xlu0 %v1290_v46 }
 0x296   : > { %v1140_v49 = vpop.f32.mrb[12].mxu1  ;;  %1294 = vmax.xlane.f32.xlu0 %v1293_v48  ;;  %v1186_v51 = vpop.f32.mrb[16].mxu0 }
 0x297   : > { %v1141_v50 = vadd.f32 %v1140_v49, %v914_v24  ;;  %v2188_v52 = vpop.f32.mrb[13].mxu1  ;;  %v1187_v53 = vadd.f32 %v1186_v51, %v914_v24  ;;  %v2194_v54 = vpop.f32.mrb[17].mxu0 }
 0x298   : > { %v1143_v55 = vpop.f32.mrb[14].mxu1  ;;  %v1189_v56 = vpop.f32.mrb[18].mxu0 }
 0x299   : > { %v2189_v57 = vpop.f32.mrb[15].mxu1  ;;  %v1296_v58 = vsel %vm915_vm3, %v1141_v50, -inf  ;;  %v2195_v59 = vpop.f32.mrb[19].mxu0  ;;  %v1299_v60 = vsel %vm915_vm3, %v1187_v53, -inf }
 0x29a   : > { %1297 = vmax.xlane.f32.xlu1 %v1296_v58  ;;  %1300 = vmax.xlane.f32.xlu0 %v1299_v60 }
 0x29e   : > { %v1232_v61 = vpop.f32.mrb[16].mxu1  ;;  %v1278_v63 = vpop.f32.mrb[20].mxu0 }
 0x29f   : > { %v1233_v62 = vadd.f32 %v1232_v61, %v914_v24  ;;  %v2200_v1 = vpop.f32.mrb[17].mxu1  ;;  %v1279_v2 = vadd.f32 %v1278_v63, %v914_v24  ;;  %v2206_v3 = vpop.f32.mrb[21].mxu0 }
 0x2a0   : > { %v1235_v4 = vpop.f32.mrb[18].mxu1  ;;  %v1281_v5 = vpop.f32.mrb[22].mxu0 }
 0x2a1   : > { %v2201_v6 = vpop.f32.mrb[19].mxu1  ;;  %v1302_v7 = vsel %vm915_vm3, %v1233_v62, -inf  ;;  %v2207_v8 = vpop.f32.mrb[23].mxu0  ;;  %v1305_v9 = vsel %vm915_vm3, %v1279_v2, -inf }
 0x2a2   : > { %1303 = vmax.xlane.f32.xlu1 %v1302_v7  ;;  %1306 = vmax.xlane.f32.xlu0 %v1305_v9 }
 0x2a6   : > { %v1286_v18 = vpop.xlane.xlu0 %1285 }
 0x2a7   : > { %v1308_v19 = vsub.f32 %v2968_v26, %v1286_v18 }
 0x2a9   : > { %v1289_v11 = vpop.xlane.xlu1 %1288  ;;  %v1316_v20 = vmul.f32 1.442695, %v1308_v19 }
 0x2aa   : > { %v1309_v12 = vsub.f32 %v1003_v32, %v1289_v11 }
 0x2ac   : > { %v1318_v14 = vmul.f32 1.442695, %v1309_v12 }
 0x2ae   : > { %2435 = vpow2.f32 %v1318_v14 }
 0x2af   : > { %2437 = vpow2.f32 %v1316_v20 }
 0x2b3   : > { %2387 = vrot.lane.b32.xlu1 %v2981_v15, %s2603_s0  ;;  %s2605_s0 = smov 8  }
 0x2b8   : > { %v2436_v16 = vpop.eup %2435 }
 0x2b9   : > { %v1335_v17 = vsel %vm915_vm3, %v2436_v16, 0.0  ;;  %v2987_v21 = vpop.eup %2437 }
 0x2ba   : > { %1336 = vadd.xlane.f32.xlu0 %v1335_v17  ;;  %v1332_v22 = vsel %vm915_vm3, %v2987_v21, 0.0 }
 0x2d7   : > { %1333 = vadd.xlane.f32.xlu1 %v1332_v22 }
 0x31f   : > { %v1292_v10 = vpop.xlane.xlu0 %1291 }
 0x320   : > { %v1310_v13 = vsub.f32 %v1049_v38, %v1292_v10 }
 0x322   : > { %v1320_v23 = vmul.f32 1.442695, %v1310_v13 }
 0x323   : > { %v1295_v24 = vpop.xlane.xlu0 %1294 }
 0x324   : > { %2439 = vpow2.f32 %v1320_v23  ;;  %v1311_v25 = vsub.f32 %v1095_v43, %v1295_v24 }
 0x326   : > { %v1322_v27 = vmul.f32 1.442695, %v1311_v25 }
 0x327   : > { %v1298_v28 = vpop.xlane.xlu1 %1297  ;;  %v1301_v30 = vpop.xlane.xlu0 %1300 }
 0x328   : > { %2441 = vpow2.f32 %v1322_v27  ;;  %v1312_v29 = vsub.f32 %v1141_v50, %v1298_v28  ;;  %v1313_v26 = vsub.f32 %v1187_v53, %v1301_v30 }
 0x32a   : > { %v1324_v31 = vmul.f32 1.442695, %v1312_v29  ;;  %v1326_v32 = vmul.f32 1.442695, %v1313_v26 }
 0x32c   : > { %2443 = vpow2.f32 %v1324_v31 }
 0x32d   : > { %2445 = vpow2.f32 %v1326_v32 }
 0x32e   : > { %v2440_v33 = vpop.eup %2439 }
 0x32f   : > { %v1304_v34 = vpop.xlane.xlu1 %1303  ;;  %v1338_v35 = vsel %vm915_vm3, %v2440_v33, 0.0  ;;  %v1307_v37 = vpop.xlane.xlu0 %1306 }
 0x330   : > { %v1314_v36 = vsub.f32 %v1233_v62, %v1304_v34  ;;  %1339 = vadd.xlane.f32.xlu1 %v1338_v35  ;;  %v1315_v38 = vsub.f32 %v1279_v2, %v1307_v37 }
 0x332   : > { %v2442_v39 = vpop.eup %2441  ;;  %v1328_v40 = vmul.f32 1.442695, %v1314_v36  ;;  %v1330_v41 = vmul.f32 1.442695, %v1315_v38 }
 0x333   : > { %v1341_v42 = vsel %vm915_vm3, %v2442_v39, 0.0  ;;  %v2388_v52 = vpop.permute.xlu1 %2387 }
 0x334   : > { %2447 = vpow2.f32 %v1328_v40  ;;  %1342 = vadd.xlane.f32.xlu0 %v1341_v42  ;;  %v2390_v53 = vunpack.i.h.bf16 %v2388_v52  ;;  %v2389_v60 = vunpack.i.l.bf16 %v2388_v52 }
 0x335   : > { %2449 = vpow2.f32 %v1330_v41 }
 0x336   : > { %v2993_v43 = vpop.eup %2443  ;;  %v909_v55 = vpack.c.bf16 %v2390_v53, %v2390_v53  ;;  %v908_v62 = vpack.c.bf16 %v2389_v60, %v2389_v60 }
 0x337   : > { %v2995_v44 = vpop.eup %2445  ;;  %v1344_v45 = vsel %vm915_vm3, %v2993_v43, 0.0 }
 0x338   : > { %1345 = vadd.xlane.f32.xlu1 %v1344_v45  ;;  %v1347_v46 = vsel %vm915_vm3, %v2995_v44, 0.0  ;;  %v1523_v58 = vsel %vm1383_vm4, %v909_v55, 0  ;;  %v1477_v2 = vsel %vm1383_vm4, %v908_v62, 0 }
 0x339   : > { %1348 = vadd.xlane.f32.xlu0 %v1347_v46 }
 0x33e   : > { %v3001_v47 = vpop.eup %2447 }
 0x33f   : > { %v3003_v48 = vpop.eup %2449  ;;  %v1350_v49 = vsel %vm915_vm3, %v3001_v47, 0.0 }
 0x340   : > { %1351 = vadd.xlane.f32.xlu1 %v1350_v49  ;;  %v1353_v50 = vsel %vm915_vm3, %v3003_v48, 0.0 }
 0x341   : > { %1354 = vadd.xlane.f32.xlu0 %v1353_v50 }
 0x347   : > { %v1337_v51 = vpop.xlane.xlu0 %1336 }
 0x348   : > { %2451 = vrcp.f32 %v1337_v51 }
 0x351   : > { %2397 = vrot.lane.b32.xlu1 %v2981_v15, %s2604_s13  ;;  %s1867_s13 = sshll.u32 %s514_s15, 4  ;;  %s3068_s13 = int_to_ptr.vmem [resolvable:$true] %s1867_s13 }
 0x352   : > { %v2452_v54 = vpop.eup %2451  ;;  %s2497_s20 = scalar_lea.vmem %s3068_s13, 256  ;;  %p2504_p1 = scmp.lt.s32.totalorder %s3068_s13, %s2502_s9 }
 0x353   : > { %v1365_v56 = vmul.f32 %v2452_v54, %v2436_v16  ;;  %p2498_p8 = scmp.ne.s32.totalorder %s3068_s13, %s2497_s20  ;;  %p2505_p3 = scmp.lt.s32.totalorder %s2503_s30, %s2497_s20 }
 0x355   : > { %v1373_v57 = vpack.c.bf16 %v1365_v56, %v1365_v56  ;;  %p2499_p11 = pnand %p2498_p8, %p3169_p0  ;;  %p2506_p5 = por %p2505_p3, %p2504_p1 }
 0x357   : > { %2217 = vmatmul.mubr.msk.bf16.vlgmr.msra.gmra.mrb[24].mxu0 %vm915_vm3, %v1373_v57  ;;  %2392 = vrot.lane.b32.xlu0 %v2981_v15, %s2602_s29  ;;  %s3166_s29 = sld [smem:[#allocation14_spill]]  ;;  %p2500_p13 = pneg %p2499_p11 }
 0x358   : > { %2227 = vmatpush3.bf16.msra.mxu0 %v1523_v58  ;;  %2228 = vmatprep.mubr.msk.bf16.mxu0 %vm2601_vm0, %v2600_v0 }
 0x359   : > { %2238 = vmatprep.subr.bf16.mxu0 %v2600_v0  ;;  %p2507_p6 = pnand %p2506_p5, %p2500_p13 }
 0x35d   : > { %v2433_v57 = vld [vmem:[%s3166_s29] sm:$0xff]  }
 0x364   : > { %v1334_v59 = vpop.xlane.xlu1 %1333 }
 0x365   : > { %2453 = vrcp.f32 %v1334_v59  ;;  %v2434_v59 = vld [vmem:[%s3166_s29 + $0x8] sm:$0xff]  }
 0x36f   : > { %v2454_v61 = vpop.eup %2453 }
 0x370   : > { %v1364_v63 = vmul.f32 %v2454_v61, %v2987_v21 }
 0x372   : > { %v1372_v1 = vpack.c.bf16 %v1364_v63, %v1364_v63 }
 0x374   : > { %2211 = vmatmul.mubr.msk.bf16.vlgmr.msra.gmra.mrb[20].mxu1 %vm915_vm3, %v1372_v1 }
 0x375   : > { %2221 = vmatpush3.bf16.msra.mxu1 %v1477_v2  ;;  %2222 = vmatprep.mubr.msk.bf16.mxu1 %vm2601_vm0, %v2600_v0 }
 0x376   : > { %2232 = vmatprep.subr.bf16.mxu1 %v2600_v0 }
 0x3bd   : > { %v1340_v3 = vpop.xlane.xlu1 %1339 }
 0x3be   : > { %2455 = vrcp.f32 %v1340_v3 }
 0x3c1   : > { %v1343_v4 = vpop.xlane.xlu0 %1342 }
 0x3c2   : > { %2457 = vrcp.f32 %v1343_v4 }
 0x3c5   : > { %v1346_v5 = vpop.xlane.xlu1 %1345 }
 0x3c6   : > { %v1349_v6 = vpop.xlane.xlu0 %1348  ;;  %2459 = vrcp.f32 %v1346_v5 }
 0x3c7   : > { %2461 = vrcp.f32 %v1349_v6 }
 0x3c8   : > { %v2456_v7 = vpop.eup %2455 }
 0x3c9   : > { %v1366_v8 = vmul.f32 %v2456_v7, %v2440_v33 }
 0x3cb   : > { %v1374_v9 = vpack.c.bf16 %v1366_v8, %v1366_v8 }
 0x3cc   : > { %v2458_v11 = vpop.eup %2457 }
 0x3cd   : > { %v1367_v12 = vmul.f32 %v2458_v11, %v2442_v39  ;;  %v1352_v14 = vpop.xlane.xlu1 %1351  ;;  %2223 = vmatmul.mubr.msk.bf16.vlgmr.msra.gmra.mrb[24].mxu1 %vm915_vm3, %v1374_v9 }
 0x3ce   : > { %v1355_v15 = vpop.xlane.xlu0 %1354  ;;  %2234 = vmatprep.mubr.msk.bf16.mxu1 %vm2601_vm0, %v2600_v0  ;;  %2463 = vrcp.f32 %v1352_v14 }
 0x3cf   : > { %v1375_v16 = vpack.c.bf16 %v1367_v12, %v1367_v12  ;;  %2465 = vrcp.f32 %v1355_v15 }
 0x3d0   : > { %v2460_v17 = vpop.eup %2459 }
 0x3d1   : > { %v2398_v18 = vpop.permute.xlu1 %2397  ;;  %2229 = vmatmul.mubr.msk.bf16.vlgmr.msra.gmra.mrb[28].mxu0 %vm915_vm3, %v1375_v16  ;;  %v2462_v19 = vpop.eup %2461  ;;  %v1368_v23 = vmul.f32 %v2460_v17, %v2993_v43 }
 0x3d2   : > { %v2393_v20 = vpop.permute.xlu0 %2392  ;;  %2240 = vmatprep.mubr.msk.bf16.mxu0 %vm2601_vm0, %v2600_v0  ;;  %v2400_v21 = vunpack.i.h.bf16 %v2398_v18  ;;  %v2399_v22 = vunpack.i.l.bf16 %v2398_v18  ;;  %v1369_v24 = vmul.f32 %v2462_v19, %v2995_v44 }
 0x3d3   : > { %v2395_v10 = vunpack.i.h.bf16 %v2393_v20  ;;  %v2394_v13 = vunpack.i.l.bf16 %v2393_v20  ;;  %v1376_v32 = vpack.c.bf16 %v1368_v23, %v1368_v23 }
 0x3d4   : > { %v913_v28 = vpack.c.bf16 %v2400_v21, %v2400_v21  ;;  %v912_v29 = vpack.c.bf16 %v2399_v22, %v2399_v22  ;;  %v1377_v33 = vpack.c.bf16 %v1369_v24, %v1369_v24 }
 0x3d5   : > { %v911_v25 = vpack.c.bf16 %v2395_v10, %v2395_v10  ;;  %v910_v27 = vpack.c.bf16 %v2394_v13, %v2394_v13 }
 0x3d6   : > { %v1661_v35 = vsel %vm1383_vm4, %v912_v29, 0  ;;  %v1707_v36 = vsel %vm1383_vm4, %v913_v28, 0 }
 0x3d7   : > { %v1569_v30 = vsel %vm1383_vm4, %v910_v27, 0  ;;  %v1615_v26 = vsel %vm1383_vm4, %v911_v25, 0 }
 0x3d8   : > { %2233 = vmatpush3.bf16.msra.mxu1 %v1569_v30  ;;  %2239 = vmatpush3.bf16.msra.mxu0 %v1615_v26  ;;  %v2464_v31 = vpop.eup %2463  ;;  %v2059_v26 = vld [vmem:[%s3167_s18] ss:$0 sm:$0xff] }
 0x3d9   : > { %2244 = vmatprep.subr.bf16.mxu1 %v2600_v0  ;;  %2250 = vmatprep.subr.bf16.mxu0 %v2600_v0  ;;  %v2466_v34 = vpop.eup %2465  ;;  %v1370_v37 = vmul.f32 %v2464_v31, %v3001_v47 }
 0x3da   : > { %v1371_v38 = vmul.f32 %v2466_v34, %v3003_v48 }
 0x3db   : > { %2235 = vmatmul.mubr.msk.bf16.vlgmr.msra.gmra.mrb[28].mxu1 %vm915_vm3, %v1376_v32  ;;  %2241 = vmatmul.mubr.msk.bf16.vlgmr.msra.gmra.mrb[32].mxu0 %vm915_vm3, %v1377_v33  ;;  %v1378_v39 = vpack.c.bf16 %v1370_v37, %v1370_v37 }
 0x3dc   : > { %2245 = vmatpush3.bf16.msra.mxu1 %v1661_v35  ;;  %2251 = vmatpush3.bf16.msra.mxu0 %v1707_v36  ;;  %v1379_v40 = vpack.c.bf16 %v1371_v38, %v1371_v38 }
 0x3dd   : > { %2246 = vmatprep.mubr.msk.bf16.mxu1 %vm2601_vm0, %v2600_v0  ;;  %2252 = vmatprep.mubr.msk.bf16.mxu0 %vm2601_vm0, %v2600_v0 }
 0x3de   : > { %2256 = vmatprep.subr.bf16.mxu1 %v2600_v0 }
 0x3e3   : > { %2247 = vmatmul.mubr.msk.bf16.vlgmr.msra.gmra.mrb[32].mxu1 %vm915_vm3, %v1378_v39  ;;  %2253 = vmatmul.mubr.msk.bf16.vlgmr.msra.gmra.mrb[36].mxu0 %vm915_vm3, %v1379_v40 }
 0x3e4   : > { %2260 = vmatprep.mubr.msk.bf16.mxu1 %vm2601_vm0, %v2600_v0  ;;  %2257 = vmatpush3.bf16.msra.mxu1 %v2433_v57 }
 0x3e5   : > { %2258 = vmatprep.subr.bf16.mxu1 %v2600_v0 }
 0x3e8   : > { %2259 = vmatpush3.bf16.msra.mxu1 %v2434_v59 }
 0x42a   : > { %v1467_v41 = vpop.f32.mrb[24].mxu0 }
 0x42b   : > { %v2218_v42 = vpop.f32.mrb[25].mxu0 }
 0x42c   : > { %v1470_v43 = vpop.f32.mrb[26].mxu0 }
 0x42d   : > { %v2219_v44 = vpop.f32.mrb[27].mxu0 }
 0x447   : > { %v1421_v45 = vpop.f32.mrb[20].mxu1 }
 0x448   : > { %v2212_v46 = vpop.f32.mrb[21].mxu1 }
 0x449   : > { %v1424_v47 = vpop.f32.mrb[22].mxu1 }
 0x44a   : > { %v2213_v48 = vpop.f32.mrb[23].mxu1 }
 0x4a0   : > { %v1513_v49 = vpop.f32.mrb[24].mxu1 }
 0x4a1   : > { %v2224_v50 = vpop.f32.mrb[25].mxu1 }
 0x4a2   : > { %v1516_v51 = vpop.f32.mrb[26].mxu1 }
 0x4a3   : > { %v2225_v52 = vpop.f32.mrb[27].mxu1 }
 0x4a4   : > { %v1559_v53 = vpop.f32.mrb[28].mxu0 }
 0x4a5   : > { %v2401_v54 = vpack.i.bf16 %v1559_v53, %v1513_v49  ;;  %v2230_v55 = vpop.f32.mrb[29].mxu0 }
 0x4a6   : > { %v1562_v56 = vpop.f32.mrb[30].mxu0 }
 0x4a7   : > { %2402 = vrot.lane.b32.xlu1 %v2401_v54, %s2605_s0  ;;  %v2231_v58 = vpop.f32.mrb[31].mxu0 }
 0x4ae   : > { %v1605_v60 = vpop.f32.mrb[28].mxu1  ;;  %v1651_v61 = vpop.f32.mrb[32].mxu0 }
 0x4af   : > { %v2406_v62 = vpack.i.bf16 %v1651_v61, %v1605_v60  ;;  %v2236_v63 = vpop.f32.mrb[29].mxu1  ;;  %v2242_v1 = vpop.f32.mrb[33].mxu0 }
 0x4b0   : > { %v1608_v2 = vpop.f32.mrb[30].mxu1  ;;  %v1654_v3 = vpop.f32.mrb[34].mxu0 }
 0x4b1   : > { %v2237_v4 = vpop.f32.mrb[31].mxu1  ;;  %2407 = vrot.lane.b32.xlu0 %v2406_v62, %s2606_s11  ;;  %v2243_v5 = vpop.f32.mrb[35].mxu0  ;;  %s3168_s11 = sld [smem:[#allocation16_spill]] }
 0x4b6   : > { %v1697_v6 = vpop.f32.mrb[32].mxu1  ;;  %v1743_v7 = vpop.f32.mrb[36].mxu0 }
 0x4b7   : > { %v2411_v8 = vpack.i.bf16 %v1743_v7, %v1697_v6  ;;  %v2248_v0 = vpop.f32.mrb[33].mxu1  ;;  %v2254_v9 = vpop.f32.mrb[37].mxu0 }
 0x4b8   : > { %v1700_v11 = vpop.f32.mrb[34].mxu1  ;;  %v1746_v12 = vpop.f32.mrb[38].mxu0 }
 0x4b9   : > { %v2249_v14 = vpop.f32.mrb[35].mxu1  ;;  %2412 = vrot.lane.b32.xlu1 %v2411_v8, %s2607_s17  ;;  %v2255_v15 = vpop.f32.mrb[39].mxu0  ;;  %s3074_s17 = scalar_lea.hbm %s3168_s11, %s2065_s16 }
 0x519   : > { %v2403_v16 = vpop.permute.xlu1 %2402 }
 0x51a   : > { %v2405_v18 = vunpack.i.h.bf16 %v2403_v16  ;;  %v2404_v19 = vunpack.i.l.bf16 %v2403_v16 }
 0x51c   : > { %v1774_v10 = vsel %vm915_vm3, %v1467_v41, %v2405_v18  ;;  %v1773_v13 = vsel %vm915_vm3, %v1421_v45, %v2404_v19 }
 0x523   : > { %v2408_v17 = vpop.permute.xlu0 %2407 }
 0x524   : > { %v2410_v20 = vunpack.i.h.bf16 %v2408_v17  ;;  %v2409_v21 = vunpack.i.l.bf16 %v2408_v17 }
 0x526   : > { %v1777_v25 = vsel %vm1775_vm5, %v1774_v10, %v2410_v20  ;;  %v1776_v27 = vsel %vm1775_vm5, %v1773_v13, %v2409_v21 }
 0x52b   : > { %v2413_v22 = vpop.permute.xlu1 %2412 }
 0x52c   : > { %v2415_v23 = vunpack.i.h.bf16 %v2413_v22  ;;  %v2414_v24 = vunpack.i.l.bf16 %v2413_v22 }
 0x52e   : > { %v1780_v28 = vsel %vm1778_vm6, %v1777_v25, %v2415_v23  ;;  %v1779_v29 = vsel %vm1778_vm6, %v1776_v27, %v2414_v24 }
 0x52f   : > { %v1781_v30 = vpack.c.bf16 %v1780_v28, %v1779_v29 }
 0x531   : > { %2261 = vmatmul.mubr.msk.bf16.vlgmr.msra.gmra.mrb[36].mxu1 %vm785_vm2, %v1781_v30 }
 0x604   : > { %v1842_v31 = vpop.f32.mrb[36].mxu1 }
 0x605   : > { %v1843_v32 = vadd.f32 %v2059_v26, %v1842_v31  ;;  %v2262_v33 = vpop.f32.mrb[37].mxu1 }
 0x606   : > { %v1845_v34 = vpop.f32.mrb[38].mxu1 }
 0x607   : > { %1849 = vst.msk [vmem:[%s514_s15] sm:$0xff] %vm785_vm2, %v1843_v32  ;;  %v1846_v35 = vadd.f32 %v2059_v26, %v1845_v34  ;;  %v2263_v36 = vpop.f32.mrb[39].mxu1 }
 0x609   : > { %1850 = vst.msk [vmem:[%s514_s15 + $0x8] sm:$0xff] %vm785_vm2, %v1846_v35 }
 0x60a   : > { %2510 = shalt.err (!%p2507_p6)
}
 0x60b   : > { %s2511_s18 = scalar_lea.hbm %s3074_s17, 256  ;;  %s2515_s25 = scalar_lea.hbm %s3168_s11, 1536 }
 0x60c   : > { %p2512_p7 = scmp.ne.s32.totalorder %s3074_s17, %s2511_s18  ;;  %p2516_p10 = scmp.lt.u32.totalorder %s3074_s17, %s3168_s11 }
 0x60d   : > { %p2517_p9 = scmp.lt.u32.totalorder %s2515_s25, %s2511_s18  ;;  %p2519_p8 = scmp.lt.u32.totalorder %s2511_s18, %s3074_s17 }
 0x60e   : > { %p2513_p2 = pnand %p2512_p7, %p3169_p0 }
 0x60f   : > { %p2518_p12 = por %p2517_p9, %p2516_p10 }
 0x610   : > { %p2514_p4 = pneg %p2513_p2 }
 0x611   : > { %p2520_p11 = por %p2519_p8, %p2518_p12 }
 0x613   : > { %p2521_p13 = pnand %p2520_p11, %p2514_p4 }
 0x615   : > { %2524 = shalt.err (!%p2521_p13)
}
 0x616   : > { %s2609_s20 = smov 128  }
 0x617   : > { %2269 = dma.vmem_to_hbm [thread:$0]  (%p3169_p0), %s3068_s13, 256, %s3074_s17, %s1852_s10, %s2609_s20, %s2609_s20, %s2605_s0  }
 0x618 PF: > { %s3170_s9 = sld [smem:[#allocation8_spill]]  ;;  %p2280_p1 = scmp.ge.s32.totalorder %s2595_s28, 2 }
 0x619   : > { %p3171_p3 = scmp.ne.s32.totalorder %s3161_s21, 0 }
 0x61b   : > { %p2276_p5 = pnand %p2280_p1, %p3171_p3 }
 0x61e   : > { %s1882_s30 = sand.u32 1, %s3170_s9  }
 0x61f   : > { %s1883_s18 = scalar_lea.sflag [#allocation4], %s1882_s30 }
 0x620   : > { %2562 = dma.done.wait (!%p2276_p5), %s1883_s18, 256  }
 0x621   : > { %2564 = vsyncadd (!%p2276_p5), %s1883_s18, 4294967040  ;;  %s28_s28 = sadd.s32 1, %s2595_s28   ;;  %s3172_s19 = sld [smem:[#allocation9_spill]] }
 0x622   : > { %p25_p6 = scmp.ge.s32.totalorder %s28_s28, 8   ;;  %s3173_s14 = sld [smem:[#allocation10_spill]] }
 0x623   : > { %s3174_s21 = smov %s2571_s22  ;;  %s3175_s22 = smov %s2575_s23 }
 0x624   : > { %s3176_s23 = smov %s2753_s12  ;;  %s3177_s24 = smov %s2587_s26 }
 0x625   : > { %s3178_s25 = smov %s2591_s27  ;;  %27 = sbr.rel (!%p25_p6) target bundleno = 14 (0xe), region = 122 }
 0x627   : > { %s3179_s26 = smov %s3172_s19 }
 0x628   : > { %s3180_s27 = smov %s3173_s14 }
 0x62c   :  { %1888 = vsyncpa [#allocation3], 1 }
 0x62d   :  { %1890 = vsyncpa [#allocation3 + $0x1], 1 }
 0x62e   :  { %1891 = vsyncpa [#allocation4], 1 }
 0x62f   :  { %1893 = vsyncpa [#allocation4 + $0x1], 1 }

</bundles_post_ra>
